<compile_context>
chip_gen: v7x
topology: tpu7x:2x2x1
jax: 0.10.0
libtpu: 0.0.40
codegen_flags: <defaults>
</compile_context>

<pallas_src>
import jax
import jax.numpy as jnp
from jax.experimental import pallas as pl
from jax.experimental.pallas import tpu as pltpu


# VMEM budget: safe on every generation (v7x: 64 MiB physical / 32 MiB scoped
# default; v6e: 128/32; v5e: 128 MiB physical / 16 MiB scoped default, raised
# here so the larger bandwidth-efficient tiles are accepted).
_VMEM_LIMIT_BYTES = 32 * 1024 * 1024
# Target bytes per tile; with double-buffered input + output (~4 live copies)
# this keeps the pipeline well under the limit above.
_TARGET_TILE_BYTES = 2 * 1024 * 1024
# Above this per-batch-element size, switch to the L-tiled two-pass path.
_SINGLE_PASS_LIMIT_BYTES = 4 * 1024 * 1024


# ----------------------------------------------------------------------------
# Kernels
# ----------------------------------------------------------------------------
def _lam_fused_kernel(gamma_ref, x_ref, o_ref):
    # gamma_ref: SMEM (1,) f32; x_ref / o_ref: VMEM (Bt, N, L) in x's dtype.
    x = x_ref[...]  # keep native dtype (bf16 stays bf16 into the MXU)

    # energy[b] = x[b] @ x[b]^T with f32 accumulation on the MXU.
    energy = jnp.einsum("bnl,bml->bnm", x, x,
                        preferred_element_type=jnp.float32)

    # softmax(rowmax(E) - E) over the last dim, fused to exp(rowmin(E) - E).
    e = jnp.exp(jnp.min(energy, axis=-1, keepdims=True) - energy)
    attention = e * pl.reciprocal(jnp.sum(e, axis=-1, keepdims=True),
                                  approx=False)

    # out[b] = attention[b] @ x[b]; attention in x's dtype, f32 accumulation.
    out = jnp.einsum("bnm,bml->bnl", attention.astype(x.dtype), x,
                     preferred_element_type=jnp.float32)

    gamma = gamma_ref[0]
    o_ref[...] = (gamma * out + x.astype(jnp.float32)).astype(o_ref.dtype)


def _lam_energy_kernel(x_ref, attn_ref, acc_ref):
    # Pass 1 of the L-tiled path: accumulate energy over L-chunks, then emit
    # attention at the final chunk.
    # x_ref: (1, N, Lt); attn_ref: (1, N, N) f32; acc_ref: VMEM (1, N, N) f32.
    l = pl.program_id(1)

    @pl.when(l == 0)
    def _():
        acc_ref[...] = jnp.zeros_like(acc_ref)

    x = x_ref[...]
    acc_ref[...] += jnp.einsum("bnl,bml->bnm", x, x,
                               preferred_element_type=jnp.float32)

    @pl.when(l == pl.num_programs(1) - 1)
    def _():
        energy = acc_ref[...]
        e = jnp.exp(jnp.min(energy, axis=-1, keepdims=True) - energy)
        attn_ref[...] = e * pl.reciprocal(jnp.sum(e, axis=-1, keepdims=True),
                                          approx=False)


def _lam_apply_kernel(gamma_ref, attn_ref, x_ref, o_ref):
    # Pass 2 of the L-tiled path: out_chunk = gamma * (attn @ x_chunk) + x_chunk.
    x = x_ref[...]                     # (1, N, Lt), native dtype
    attn = attn_ref[...]               # (1, N, N), f32
    out = jnp.einsum("bnm,bml->bnl", attn.astype(x.dtype), x,
                     preferred_element_type=jnp.float32)
    o_ref[...] = (gamma_ref[0] * out + x.astype(jnp.float32)).astype(o_ref.dtype)


# ----------------------------------------------------------------------------
# Tiling heuristics
# ----------------------------------------------------------------------------
def _pick_batch_tile(B, bytes_per_batch, target_bytes):
    """Largest Bt dividing B with Bt * bytes_per_batch <= target (min 1)."""
    bt = max(1, min(B, target_bytes // max(1, bytes_per_batch)))
    while B % bt != 0:
        bt -= 1
    return bt


def _pick_l_tile(L, N, itemsize, target_bytes):
    """Largest Lt (multiple of 128, dividing L) with N*Lt*itemsize <= target."""
    if L % 128 != 0:
        return L  # last block dim must then span the full array dim
    max_lt = max(128, (target_bytes // (N * itemsize)) // 128 * 128)
    lt = min(L, max_lt)
    while L % lt != 0:
        lt -= 128
    return max(lt, 128)


# ----------------------------------------------------------------------------
# Wrappers
# ----------------------------------------------------------------------------
def _lam_single_pass(gamma, xf, bt):
    B, N, L = xf.shape
    return pl.pallas_call(
        _lam_fused_kernel,
        out_shape=jax.ShapeDtypeStruct((B, N, L), xf.dtype),
        grid_spec=pltpu.PrefetchScalarGridSpec(
            num_scalar_prefetch=0,
            grid=(B // bt,),
            in_specs=[
                pl.BlockSpec(memory_space=pltpu.SMEM),              # gamma
                pl.BlockSpec((bt, N, L), lambda b: (b, 0, 0)),      # x tile
            ],
            out_specs=pl.BlockSpec((bt, N, L), lambda b: (b, 0, 0)),
        ),
        compiler_params=pltpu.CompilerParams(
            dimension_semantics=("parallel",),
            vmem_limit_bytes=_VMEM_LIMIT_BYTES),
    )(gamma, xf)


def _lam_two_pass(gamma, xf, lt):
    B, N, L = xf.shape
    grid = (B, L // lt)

    # Pass 1: accumulate energy over L-chunks, emit attention (B, N, N) f32.
    attention = pl.pallas_call(
        _lam_energy_kernel,
        out_shape=jax.ShapeDtypeStruct((B, N, N), jnp.float32),
        grid_spec=pltpu.PrefetchScalarGridSpec(
            num_scalar_prefetch=0,
            grid=grid,
            in_specs=[pl.BlockSpec((1, N, lt), lambda b, l: (b, 0, l))],
            out_specs=pl.BlockSpec((1, N, N), lambda b, l: (b, 0, 0)),
            scratch_shapes=[pltpu.VMEM((1, N, N), jnp.float32)],
        ),
        compiler_params=pltpu.CompilerParams(
            dimension_semantics=("parallel", "arbitrary"),
            vmem_limit_bytes=_VMEM_LIMIT_BYTES),
    )(xf)

    # Pass 2: out = gamma * (attention @ x) + x, chunk-wise over L.
    return pl.pallas_call(
        _lam_apply_kernel,
        out_shape=jax.ShapeDtypeStruct((B, N, L), xf.dtype),
        grid_spec=pltpu.PrefetchScalarGridSpec(
            num_scalar_prefetch=0,
            grid=grid,
            in_specs=[
                pl.BlockSpec(memory_space=pltpu.SMEM),                 # gamma
                pl.BlockSpec((1, N, N), lambda b, l: (b, 0, 0)),       # attention
                pl.BlockSpec((1, N, lt), lambda b, l: (b, 0, l)),      # x chunk
            ],
            out_specs=pl.BlockSpec((1, N, lt), lambda b, l: (b, 0, l)),
        ),
        compiler_params=pltpu.CompilerParams(
            dimension_semantics=("parallel", "parallel"),
            vmem_limit_bytes=_VMEM_LIMIT_BYTES),
    )(gamma, attention, xf)


def lam_module_forward(x, gamma, *,
                       target_tile_bytes=_TARGET_TILE_BYTES,
                       single_pass_limit_bytes=_SINGLE_PASS_LIMIT_BYTES):
    """x: (B, N, C, H, W); gamma: (1,) parameter. Returns (B, N*C, H, W)."""
    B, N, C, H, W = x.shape
    L = C * H * W
    xf = x.reshape(B, N, L)
    gamma = jnp.asarray(gamma, dtype=jnp.float32).reshape((1,))

    itemsize = jnp.dtype(x.dtype).itemsize
    bytes_per_batch = N * L * itemsize

    if bytes_per_batch <= single_pass_limit_bytes:
        bt = _pick_batch_tile(B, bytes_per_batch, target_tile_bytes)
        out = _lam_single_pass(gamma, xf, bt)
    else:
        lt = _pick_l_tile(L, N, itemsize, target_tile_bytes)
        out = _lam_two_pass(gamma, xf, lt)

    return out.reshape(B, N * C, H, W)


def lam_module_reference(x, gamma):
    """Pure-JAX reference mirroring the PyTorch forward (f32 math)."""
    B, N, C, H, W = x.shape
    proj = x.reshape(B, N, -1).astype(jnp.float32)
    energy = jnp.einsum("bnl,bml->bnm", proj, proj,
                        precision=jax.lax.Precision.HIGHEST)
    energy_new = jnp.max(energy, axis=-1, keepdims=True) - energy
    attention = jax.nn.softmax(energy_new, axis=-1)
    out = jnp.einsum("bnm,bml->bnl", attention, proj,
                     precision=jax.lax.Precision.HIGHEST)
    out = gamma[0] * out + proj
    return out.reshape(B, N * C, H, W).astype(x.dtype)


if __name__ == "__main__":
    key = jax.random.PRNGKey(0)
    B, N, C, H, W = 2, 4, 4, 16, 16
    x = jax.random.normal(key, (B, N, C, H, W), dtype=jnp.float32)

    # Parameter per __init__: gamma = zeros(1).
    gamma = jnp.zeros((1,), dtype=jnp.float32)
    out = jax.block_until_ready(lam_module_forward(x, gamma))
    ref = lam_module_reference(x, gamma)
    assert out.shape == (B, N * C, H, W)
    assert jnp.allclose(out, ref, atol=1e-5, rtol=1e-5)

    # Non-zero gamma exercises the attention path (single-pass fused kernel).
    gamma2 = jnp.full((1,), 0.5, dtype=jnp.float32)
    out2 = jax.block_until_ready(lam_module_forward(x, gamma2))
    ref2 = lam_module_reference(x, gamma2)
    assert jnp.allclose(out2, ref2, atol=1e-4, rtol=1e-4)

    # Force the L-tiled two-pass path (used when one batch element is too big
    # for a single VMEM tile) at these small shapes to check it end-to-end.
    out3 = jax.block_until_ready(
        lam_module_forward(x, gamma2,
                           single_pass_limit_bytes=0,
                           target_tile_bytes=8 * 1024))
    assert jnp.allclose(out3, ref2, atol=1e-4, rtol=1e-4)

    # bf16 inputs take the native-dtype MXU path (f32 accumulation).
    xb = x.astype(jnp.bfloat16)
    outb = jax.block_until_ready(lam_module_forward(xb, gamma2))
    refb = lam_module_reference(xb, gamma2)
    assert jnp.allclose(outb.astype(jnp.float32), refb.astype(jnp.float32),
                        atol=1e-1, rtol=1e-1)

    print("KERNEL_OK")
</pallas_src>

<mosaic_0001>
module attributes {stable_mosaic.version = 11 : i64} {
  func.func @_lam_fused_kernel(%arg0: i32, %arg1: memref<1xf32, #tpu.memory_space<smem>>, %arg2: memref<2x4x1024xf32, #tpu.memory_space<vmem>>, %arg3: memref<2x4x1024xf32, #tpu.memory_space<vmem>>) attributes {dimension_semantics = [#tpu.dimension_semantics<parallel>], iteration_bounds = array<i64: 1>, scalar_prefetch = 0 : i64, scratch_operands = 0 : i64, tpu.core_type = #tpu.core_type<tc>, window_params = [{transform_indices = @transform_0, window_bounds = array<i64: 1>}, {transform_indices = @transform_1, window_bounds = array<i64: 2, 4, 1024>}, {transform_indices = @transform_2, window_bounds = array<i64: 2, 4, 1024>}]} {
    %c0 = arith.constant 0 : index
    %c0_0 = arith.constant 0 : index
    %c0_1 = arith.constant 0 : index
    %0 = vector.load %arg2[%c0, %c0_0, %c0_1] : memref<2x4x1024xf32, #tpu.memory_space<vmem>>, vector<2x4x1024xf32>
    "tpu.trace_start"() <{level = 10 : i32, message = "bnl,bml->bnm"}> : () -> ()
    %cst = arith.constant dense<0.000000e+00> : vector<2x4x4xf32>
    %1 = tpu.matmul %0, %0, %cst {dimension_numbers = #tpu.dot_dimension_numbers<[2], [2], [1], [1], [0, 0, 0, 1, 1, 1], [0], [0]>} : vector<2x4x1024xf32>, vector<2x4x1024xf32>, vector<2x4x4xf32> -> vector<2x4x4xf32>
    "tpu.trace_stop"() : () -> ()
    %cst_2 = arith.constant dense<0x7F800000> : vector<2x4xf32>
    %2 = vector.multi_reduction <minimumf>, %1, %cst_2 [2] : vector<2x4x4xf32> to vector<2x4xf32>
    %3 = vector.shape_cast %2 : vector<2x4xf32> to vector<2x4x1xf32>
    %4 = vector.broadcast %3 : vector<2x4x1xf32> to vector<2x4x4xf32>
    %5 = arith.subf %4, %1 : vector<2x4x4xf32>
    %6 = math.exp %5 : vector<2x4x4xf32>
    %cst_3 = arith.constant dense<0.000000e+00> : vector<2x4xf32>
    %7 = vector.multi_reduction <add>, %6, %cst_3 [2] : vector<2x4x4xf32> to vector<2x4xf32>
    %8 = vector.shape_cast %7 : vector<2x4xf32> to vector<2x4x1xf32>
    %9 = tpu.reciprocal %8 : vector<2x4x1xf32> -> vector<2x4x1xf32>
    %10 = vector.broadcast %9 : vector<2x4x1xf32> to vector<2x4x4xf32>
    %11 = arith.mulf %6, %10 : vector<2x4x4xf32>
    "tpu.trace_start"() <{level = 10 : i32, message = "bnm,bml->bnl"}> : () -> ()
    %cst_4 = arith.constant dense<0.000000e+00> : vector<2x4x1024xf32>
    %12 = tpu.matmul %11, %0, %cst_4 {dimension_numbers = #tpu.dot_dimension_numbers<[2], [1], [1], [2], [0, 0, 0, 1, 1, 2], [0], [0]>} : vector<2x4x4xf32>, vector<2x4x1024xf32>, vector<2x4x1024xf32> -> vector<2x4x1024xf32>
    "tpu.trace_stop"() : () -> ()
    %c0_5 = arith.constant 0 : index
    %13 = memref.load %arg1[%c0_5] : memref<1xf32, #tpu.memory_space<smem>>
    %14 = vector.broadcast %13 : f32 to vector<2x4x1024xf32>
    %15 = arith.mulf %14, %12 : vector<2x4x1024xf32>
    %16 = arith.addf %15, %0 : vector<2x4x1024xf32>
    %c0_6 = arith.constant 0 : index
    %c0_7 = arith.constant 0 : index
    %c0_8 = arith.constant 0 : index
    %17 = vector.load %arg3[%c0_6, %c0_7, %c0_8] : memref<2x4x1024xf32, #tpu.memory_space<vmem>>, vector<2x4x1024xf32>
    tpu.vector_store %arg3[%c0_6, %c0_7, %c0_8], %16 {strides = array<i32>} : memref<2x4x1024xf32, #tpu.memory_space<vmem>>, vector<2x4x1024xf32>,
    return
  }
  func.func @transform_0(%arg0: i32) -> i32 {
    %c0_i32 = arith.constant 0 : i32
    %c0_i32_0 = arith.constant 0 : i32
    return %c0_i32 : i32
  }
  func.func @transform_1(%arg0: i32) -> (i32, i32, i32) {
    %c0_i32 = arith.constant 0 : i32
    %c0_i32_0 = arith.constant 0 : i32
    %c0_i32_1 = arith.constant 0 : i32
    return %arg0, %c0_i32, %c0_i32_0 : i32, i32, i32
  }
  func.func @transform_2(%arg0: i32) -> (i32, i32, i32) {
    %c0_i32 = arith.constant 0 : i32
    %c0_i32_0 = arith.constant 0 : i32
    %c0_i32_1 = arith.constant 0 : i32
    return %arg0, %c0_i32, %c0_i32_0 : i32, i32, i32
  }
}

</mosaic_0001>

<bundles_post_ra>
// kernel: tpu_custom_call.1
= control target key start
LH: loop header
LB: loop body
LE: loop exit
PB: predicated region body
PF: predicated region fallthrough
CT: control target
= control target key end

     0   :  { %8 = vsyncpa [#allocation4], 0  ;;  %s1639_s0 = inlined_call_operand.<no memory space> [shape: f32[1], index: 0, kind: input, shape index: {}]   ;;  %s1640_s1 = inlined_call_operand.hbm [shape: f32[2,4,1024], index: 1, kind: input, shape index: {}]   ;;  %s1641_s2 = inlined_call_operand.hbm [shape: f32[2,4,1024], index: 2, kind: output, shape index: {}]  }
   0x1   :  { %9 = vsyncpa [#allocation5], 0  ;;  %s1446_s9 = smov [#allocation3]   ;;  %s1398_s13 = scalar_lea.hbm %s1640_s1, 1024 }
   0x2   :  { %s17_s10 = sshll.u32 %s1446_s9, 4  ;;  %p1399_p0 = scmp.ne.s32.totalorder %s1640_s1, %s1398_s13  ;;  %s18_s10 = int_to_ptr.vmem [resolvable:$true] %s17_s10 }
   0x3   :  { %p1402_p1 = scmp.lt.u32.totalorder %s1398_s13, %s1640_s1 }
   0x5   :  { %p1404_p2 = pnand %p1402_p1, %p1399_p0 }
   0x7   :  { %1407 = shalt.err (!%p1404_p2)
}
   0x8   :  { %s1408_s18 = scalar_lea.vmem %s18_s10, 1024  ;;  %p1413_p4 = scmp.lt.s32.totalorder %s18_s10, %s18_s10 }
   0x9   :  { %p1409_p3 = scmp.ne.s32.totalorder %s18_s10, %s1408_s18  ;;  %p1414_p5 = scmp.lt.s32.totalorder %s1408_s18, %s1408_s18 }
   0xb   :  { %p1415_p6 = por %p1414_p5, %p1413_p4 }
   0xd   :  { %p1416_p7 = pnand %p1415_p6, %p1409_p3 }
   0xf   :  { %1419 = shalt.err (!%p1416_p7)
}
  0x10   :  { %s1447_s19 = smov 512   ;;  %s1448_s20 = smov 32  }
  0x11   :  { %23 = dma.hbm_to_vmem [thread:$0]  %s1640_s1, 1024, %s18_s10, [#allocation4], %s1447_s19, %s1447_s19, %s1448_s20  }
  0x12   :  { %1442 = dma.done.wait [#allocation4], 1024  }
  0x13   :  { %1443 = vsyncadd [#allocation4], 4294966272  ;;  %v1481_v0 = vld [vmem:[#allocation3] sm:$0xff]  ;;  %v1485_v2 = vld [vmem:[#allocation3 + $0x8] sm:$0xff]  ;;  %vm619_vm0 = vcmask 27648   ;;  %vm646_vm1 = vcmask 1043456   ;;  %v1251_v39 = vstv %s1639_s0 }
  0x14   :  { %v1483_v1 = vld [vmem:[#allocation3 + $0x20] sm:$0xff]  ;;  %v1489_v3 = vcombine.high %v1481_v0, %v1481_v0  ;;  %v1495_v5 = vld [vmem:[#allocation3 + $0x28] sm:$0xff]  ;;  %v1499_v6 = vcombine.high %v1485_v2, %v1485_v2  ;;  %v1507_v8 = vld [vmem:[#allocation3 + $0x10] sm:$0xff]  ;;  %v1449_v32 = vmov 0.0   ;;  %vm642_vm2 = vcmask 31744   ;;  %s1450_s0 = smov [#allocation6]  }
  0x15   :  { %v1493_v4 = vcombine.high %v1483_v1, %v1483_v1  ;;  %v1503_v7 = vcombine.high %v1495_v5, %v1495_v5  ;;  %v1509_v9 = vld [vmem:[#allocation3 + $0x30] sm:$0xff]  ;;  %v1519_v10 = vcombine.high %v1507_v8, %v1507_v8  ;;  %v1533_v12 = vld [vmem:[#allocation3 + $0x18] sm:$0xff]  ;;  %s1329_s24 = sshll.u32 %s1450_s0, 4  ;;  %s1330_s24 = int_to_ptr.vmem [resolvable:$true] %s1329_s24 }
  0x16   :  { %47 = vmatprep.subr.mxu0 %v1489_v3  ;;  %111 = vmatprep.mubr.f32.mxu0 %v1489_v3  ;;  %v1523_v11 = vcombine.high %v1509_v9, %v1509_v9  ;;  %v1535_v13 = vld [vmem:[#allocation3 + $0x38] sm:$0xff]  ;;  %v1539_v14 = vcombine.high %v1533_v12, %v1533_v12  ;;  %s1420_s25 = scalar_lea.vmem %s1330_s24, 1024  ;;  %p1425_p9 = scmp.lt.s32.totalorder %s1330_s24, %s1330_s24 }
  0x17   :  { %339 = vmatprep.subr.mxu1 %v1493_v4  ;;  %48 = vmatpush1.xpose.msra.mxu0 %v1481_v0  ;;  %v1543_v15 = vcombine.high %v1535_v13, %v1535_v13  ;;  %p1421_p8 = scmp.ne.s32.totalorder %s1330_s24, %s1420_s25  ;;  %p1426_p10 = scmp.lt.s32.totalorder %s1420_s25, %s1420_s25 }
  0x18   :  { %340 = vmatpush1.xpose.msra.mxu1 %v1483_v1  ;;  %403 = vmatprep.mubr.f32.mxu1 %v1493_v4 }
  0x19   :  { %117 = vmatprep.subr.mxu0 %v1499_v6  ;;  %409 = vmatprep.subr.mxu1 %v1503_v7  ;;  %p1427_p11 = por %p1426_p10, %p1425_p9 }
  0x1a   :  { %112 = vmatmul.mubr.f32.vlgmr.msra.gmra.mrb[0].mxu0 %v1481_v0 }
  0x1b   :  { %404 = vmatmul.mubr.f32.vlgmr.msra.gmra.mrb[0].mxu1 %v1483_v1  ;;  %118 = vmatpush1.xpose.msra.mxu0 %v1485_v2  ;;  %p1428_p12 = pnand %p1427_p11, %p1421_p8 }
  0x1c   :  { %410 = vmatpush1.xpose.msra.mxu1 %v1495_v5  ;;  %181 = vmatprep.mubr.f32.mxu0 %v1499_v6 }
  0x1d   :  { %473 = vmatprep.mubr.f32.mxu1 %v1503_v7  ;;  %187 = vmatprep.subr.mxu0 %v1519_v10 }
  0x1e   :  { %479 = vmatprep.subr.mxu1 %v1523_v11 }
  0x22   :  { %182 = vmatmul.mubr.f32.vlgmr.msra.gmra.mrb[0].mxu0 %v1485_v2 }
  0x23   :  { %474 = vmatmul.mubr.f32.vlgmr.msra.gmra.mrb[0].mxu1 %v1495_v5  ;;  %188 = vmatpush1.xpose.msra.mxu0 %v1507_v8 }
  0x24   :  { %480 = vmatpush1.xpose.msra.mxu1 %v1509_v9  ;;  %251 = vmatprep.mubr.f32.mxu0 %v1519_v10 }
  0x25   :  { %543 = vmatprep.mubr.f32.mxu1 %v1523_v11  ;;  %257 = vmatprep.subr.mxu0 %v1539_v14 }
  0x26   :  { %549 = vmatprep.subr.mxu1 %v1543_v15 }
  0x2a   :  { %252 = vmatmul.mubr.f32.vlgmr.msra.gmra.mrb[0].mxu0 %v1507_v8 }
  0x2b   :  { %544 = vmatmul.mubr.f32.vlgmr.msra.gmra.mrb[0].mxu1 %v1509_v9  ;;  %258 = vmatpush1.xpose.msra.mxu0 %v1533_v12 }
  0x2c   :  { %550 = vmatpush1.xpose.msra.mxu1 %v1535_v13  ;;  %321 = vmatprep.mubr.f32.mxu0 %v1539_v14 }
  0x2d   :  { %613 = vmatprep.mubr.f32.mxu1 %v1543_v15  ;;  %1341 = vmatprep.subr.msk.mxu0 %vm646_vm1, %v1489_v3 }
  0x2e   :  { %1344 = vmatprep.subr.msk.mxu1 %vm646_vm1, %v1499_v6 }
  0x32   :  { %322 = vmatmul.mubr.f32.vlgmr.msra.gmra.mrb[0].mxu0 %v1533_v12 }
  0x33   :  { %614 = vmatmul.mubr.f32.vlgmr.msra.gmra.mrb[0].mxu1 %v1535_v13  ;;  %1342 = vmatpush1.msk.msra.mxu0 %vm646_vm1, %v1481_v0 }
  0x34   :  { %1345 = vmatpush1.msk.msra.mxu1 %vm646_vm1, %v1485_v2  ;;  %727 = vmatprep.mubr.f32.mxu0 %v1449_v32 }
  0x35   :  { %798 = vmatprep.mubr.f32.mxu1 %v1449_v32  ;;  %1347 = vmatprep.subr.msk.mxu0 %vm646_vm1, %v1519_v10 }
  0x36   :  { %1350 = vmatprep.subr.msk.mxu1 %vm646_vm1, %v1539_v14 }
 0x105   :  { %v323_v16 = vpop.f32.mrb[0].mxu0 }
 0x106   :  { %v615_v17 = vpop.f32.mrb[0].mxu1  ;;  %v325_v18 = vpop.f32.mrb[1].mxu0  ;;  %v620_v20 = vsel %vm619_vm0, %v323_v16, inf }
 0x107   :  { %v617_v19 = vpop.f32.mrb[1].mxu1  ;;  %621 = vmin.xlane.f32.xlu0 %v620_v20  ;;  %v623_v21 = vsel %vm619_vm0, %v615_v17, inf }
 0x10b   :  { %624 = vmin.xlane.f32.xlu0 %v623_v21 }
 0x194   :  { %v622_v22 = vpop.xlane.xlu0 %621 }
 0x195   :  { %v626_v23 = vsub.f32 %v622_v22, %v323_v16 }
 0x197   :  { %v628_v24 = vmul.f32 1.442695, %v626_v23 }
 0x198   :  { %v625_v25 = vpop.xlane.xlu0 %624 }
 0x199   :  { %1390 = vpow2.f32 %v628_v24  ;;  %v627_v26 = vsub.f32 %v625_v25, %v615_v17 }
 0x19b   :  { %v630_v27 = vmul.f32 1.442695, %v627_v26 }
 0x19d   :  { %1392 = vpow2.f32 %v630_v27 }
 0x1a3   :  { %v1391_v28 = vpop.eup %1390 }
 0x1a4   :  { %v632_v29 = vsel %vm619_vm0, %v1391_v28, 0.0 }
 0x1a5   :  { %633 = vadd.xlane.f32.xlu1 %v632_v29 }
 0x1a7   :  { %v1393_v30 = vpop.eup %1392 }
 0x1a8   :  { %v635_v31 = vsel %vm619_vm0, %v1393_v30, 0.0 }
 0x1a9   :  { %636 = vadd.xlane.f32.xlu1 %v635_v31 }
 0x232   :  { %v634_v33 = vpop.xlane.xlu1 %633 }
 0x233   :  { %1394 = vrcp.f32 %v634_v33 }
 0x236   :  { %v637_v34 = vpop.xlane.xlu1 %636 }
 0x237   :  { %1396 = vrcp.f32 %v637_v34 }
 0x23d   :  { %v1395_v35 = vpop.eup %1394 }
 0x23e   :  { %v640_v36 = vmul.f32 %v1395_v35, %v1391_v28 }
 0x240   :  { %1343 = vmatmul.mubr.msk.f32.vlgmr.msra.gmra.mrb[2].mxu0 %vm642_vm2, %v640_v36  ;;  %1346 = vmatmul.mubr.msk.f32.vlgmr.msra.gmra.mrb[2].mxu1 %vm642_vm2, %v640_v36 }
 0x241   :  { %1348 = vmatpush1.msk.msra.mxu0 %vm646_vm1, %v1507_v8  ;;  %1351 = vmatpush1.msk.msra.mxu1 %vm646_vm1, %v1533_v12  ;;  %v1397_v37 = vpop.eup %1396 }
 0x242   :  { %869 = vmatprep.mubr.f32.mxu0 %v1449_v32  ;;  %940 = vmatprep.mubr.f32.mxu1 %v1449_v32  ;;  %v641_v38 = vmul.f32 %v1397_v37, %v1393_v30 }
 0x243   :  { %1353 = vmatprep.subr.msk.mxu0 %vm646_vm1, %v1493_v4  ;;  %1356 = vmatprep.subr.msk.mxu1 %vm646_vm1, %v1503_v7 }
 0x244   :  { %1349 = vmatmul.mubr.msk.f32.vlgmr.msra.gmra.mrb[4].mxu0 %vm642_vm2, %v640_v36  ;;  %1352 = vmatmul.mubr.msk.f32.vlgmr.msra.gmra.mrb[4].mxu1 %vm642_vm2, %v640_v36 }
 0x245   :  { %1354 = vmatpush1.msk.msra.mxu0 %vm646_vm1, %v1483_v1  ;;  %1357 = vmatpush1.msk.msra.mxu1 %vm646_vm1, %v1495_v5 }
 0x246   :  { %1030 = vmatprep.mubr.f32.mxu0 %v1449_v32  ;;  %1101 = vmatprep.mubr.f32.mxu1 %v1449_v32 }
 0x247   :  { %1359 = vmatprep.subr.msk.mxu0 %vm646_vm1, %v1523_v11  ;;  %1362 = vmatprep.subr.msk.mxu1 %vm646_vm1, %v1543_v15 }
 0x248   :  { %1355 = vmatmul.mubr.msk.f32.vlgmr.msra.gmra.mrb[6].mxu0 %vm642_vm2, %v641_v38  ;;  %1358 = vmatmul.mubr.msk.f32.vlgmr.msra.gmra.mrb[6].mxu1 %vm642_vm2, %v641_v38 }
 0x249   :  { %1360 = vmatpush1.msk.msra.mxu0 %vm646_vm1, %v1509_v9  ;;  %1363 = vmatpush1.msk.msra.mxu1 %vm646_vm1, %v1535_v13 }
 0x24a   :  { %1172 = vmatprep.mubr.f32.mxu0 %v1449_v32  ;;  %1243 = vmatprep.mubr.f32.mxu1 %v1449_v32 }
 0x24c   :  { %1361 = vmatmul.mubr.msk.f32.vlgmr.msra.gmra.mrb[8].mxu0 %vm642_vm2, %v641_v38  ;;  %1364 = vmatmul.mubr.msk.f32.vlgmr.msra.gmra.mrb[8].mxu1 %vm642_vm2, %v641_v38 }
 0x313   :  { %v729_v40 = vpop.f32.mrb[2].mxu0  ;;  %v800_v41 = vpop.f32.mrb[2].mxu1 }
 0x314   :  { %v1252_v42 = vmul.f32 %v1251_v39, %v729_v40  ;;  %v1254_v43 = vmul.f32 %v1251_v39, %v800_v41  ;;  %v731_v44 = vpop.f32.mrb[3].mxu0  ;;  %v802_v45 = vpop.f32.mrb[3].mxu1 }
 0x315   :  { %v1253_v46 = vmul.f32 %v1251_v39, %v731_v44  ;;  %v1255_v47 = vmul.f32 %v1251_v39, %v802_v45 }
 0x316   :  { %v1268_v48 = vadd.f32 %v1252_v42, %v1481_v0  ;;  %v1270_v49 = vadd.f32 %v1254_v43, %v1485_v2 }
 0x317   :  { %v1269_v50 = vadd.f32 %v1253_v46, %v1489_v3  ;;  %v1271_v51 = vadd.f32 %v1255_v47, %v1499_v6  ;;  %v871_v52 = vpop.f32.mrb[4].mxu0  ;;  %v942_v53 = vpop.f32.mrb[4].mxu1 }
 0x318   :  { %v1256_v54 = vmul.f32 %v1251_v39, %v871_v52  ;;  %v1258_v55 = vmul.f32 %v1251_v39, %v942_v53  ;;  %v873_v56 = vpop.f32.mrb[5].mxu0  ;;  %v944_v57 = vpop.f32.mrb[5].mxu1 }
 0x319   :  { %v1300_v58 = vcombine.low %v1268_v48, %v1269_v50  ;;  %v1301_v59 = vcombine.low %v1270_v49, %v1271_v51  ;;  %v1257_v60 = vmul.f32 %v1251_v39, %v873_v56  ;;  %v1259_v61 = vmul.f32 %v1251_v39, %v944_v57 }
 0x31a   :  { %v1272_v62 = vadd.f32 %v1256_v54, %v1507_v8  ;;  %v1274_v63 = vadd.f32 %v1258_v55, %v1533_v12 }
 0x31b   :  { %1316 = vst [vmem:[#allocation6] sm:$0xff] %v1300_v58  ;;  %1317 = vst [vmem:[#allocation6 + $0x8] sm:$0xff] %v1301_v59  ;;  %v1273_v0 = vadd.f32 %v1257_v60, %v1519_v10  ;;  %v1275_v2 = vadd.f32 %v1259_v61, %v1539_v14  ;;  %v1032_v3 = vpop.f32.mrb[6].mxu0  ;;  %v1103_v6 = vpop.f32.mrb[6].mxu1 }
 0x31c   :  { %v1260_v16 = vmul.f32 %v1251_v39, %v1032_v3  ;;  %v1262_v17 = vmul.f32 %v1251_v39, %v1103_v6  ;;  %v1034_v18 = vpop.f32.mrb[7].mxu0  ;;  %v1105_v19 = vpop.f32.mrb[7].mxu1 }
 0x31d   :  { %v1302_v20 = vcombine.low %v1272_v62, %v1273_v0  ;;  %v1303_v21 = vcombine.low %v1274_v63, %v1275_v2  ;;  %v1261_v22 = vmul.f32 %v1251_v39, %v1034_v18  ;;  %v1263_v23 = vmul.f32 %v1251_v39, %v1105_v19 }
 0x31e   :  { %v1276_v8 = vadd.f32 %v1260_v16, %v1483_v1  ;;  %v1278_v12 = vadd.f32 %v1262_v17, %v1495_v5 }
 0x31f   :  { %1318 = vst [vmem:[#allocation6 + $0x10] sm:$0xff] %v1302_v20  ;;  %1319 = vst [vmem:[#allocation6 + $0x18] sm:$0xff] %v1303_v21  ;;  %v1277_v10 = vadd.f32 %v1261_v22, %v1493_v4  ;;  %v1279_v14 = vadd.f32 %v1263_v23, %v1503_v7  ;;  %v1174_v24 = vpop.f32.mrb[8].mxu0  ;;  %v1245_v25 = vpop.f32.mrb[8].mxu1 }
 0x320   :  { %v1264_v26 = vmul.f32 %v1251_v39, %v1174_v24  ;;  %v1266_v27 = vmul.f32 %v1251_v39, %v1245_v25  ;;  %v1176_v28 = vpop.f32.mrb[9].mxu0  ;;  %v1247_v29 = vpop.f32.mrb[9].mxu1 }
 0x321   :  { %v1304_v30 = vcombine.low %v1276_v8, %v1277_v10  ;;  %v1305_v31 = vcombine.low %v1278_v12, %v1279_v14  ;;  %v1265_v32 = vmul.f32 %v1251_v39, %v1176_v28  ;;  %v1267_v33 = vmul.f32 %v1251_v39, %v1247_v29 }
 0x322   :  { %v1280_v1 = vadd.f32 %v1264_v26, %v1509_v9  ;;  %v1282_v5 = vadd.f32 %v1266_v27, %v1535_v13 }
 0x323   :  { %1320 = vst [vmem:[#allocation6 + $0x20] sm:$0xff] %v1304_v30  ;;  %1321 = vst [vmem:[#allocation6 + $0x28] sm:$0xff] %v1305_v31  ;;  %v1281_v4 = vadd.f32 %v1265_v32, %v1523_v11  ;;  %v1283_v7 = vadd.f32 %v1267_v33, %v1543_v15 }
 0x325   :  { %v1306_v34 = vcombine.low %v1280_v1, %v1281_v4  ;;  %v1307_v35 = vcombine.low %v1282_v5, %v1283_v7 }
 0x327   :  { %1322 = vst [vmem:[#allocation6 + $0x30] sm:$0xff] %v1306_v34  ;;  %1323 = vst [vmem:[#allocation6 + $0x38] sm:$0xff] %v1307_v35 }
 0x328   :  { %1431 = shalt.err (!%p1428_p12)
}
 0x329   :  { %s1432_s28 = scalar_lea.hbm %s1641_s2, 1024 }
 0x32a   :  { %p1433_p13 = scmp.ne.s32.totalorder %s1641_s2, %s1432_s28  ;;  %p1436_p0 = scmp.lt.u32.totalorder %s1432_s28, %s1641_s2 }
 0x32c   :  { %p1438_p1 = pnand %p1436_p0, %p1433_p13 }
 0x32e   :  { %1441 = shalt.err (!%p1438_p1)
}
 0x32f   :  { %1335 = dma.vmem_to_hbm [thread:$0]  %s1330_s24, 1024, %s1641_s2, [#allocation5], %s1447_s19, %s1447_s19, %s1448_s20  }
 0x330   :  { %1444 = dma.done.wait [#allocation5], 1024  }
 0x331   :  { %1445 = vsyncadd [#allocation5], 4294966272 }
 0x332   :  { %1339 = vsyncpa [#allocation4], 1 }
 0x333   :  { %1340 = vsyncpa [#allocation5], 1 }

</bundles_post_ra>
